<compile_context>
chip_gen: v6e
topology: v6e:2x2x1
jax: 0.10.0
libtpu: 0.0.40
codegen_flags: <defaults>
</compile_context>

<pallas_src>
import functools

import jax
import jax.numpy as jnp
from jax.experimental import pallas as pl
from jax.experimental.pallas import tpu as pltpu


# ---------------------------------------------------------------------------
# Kernel
# ---------------------------------------------------------------------------
def clamp_kernel(audio_ref, melody_ref, text_ref,
                 wa_ref, ba_ref, wm_ref, bm_ref, wt_ref, bt_ref,
                 out_ref, acc_a_ref, acc_t_ref,
                 *, n_hw, n_s, n_red, inv_hw, inv_s, emb_dim):
    k = pl.program_id(1)

    @pl.when(k == 0)
    def _init():
        acc_a_ref[...] = jnp.zeros_like(acc_a_ref)
        acc_t_ref[...] = jnp.zeros_like(acc_t_ref)

    # ---- streamed partial sums (f32 accumulation) ----
    # Audio: pure element-wise VPU adds into a lane-wide f32 scratch.  The
    # cross-lane (XLU) reduce is deferred to finalize so the per-step work
    # hides under the HBM DMA (v6e/v7x only have 2 XLUs).
    def _acc_audio():
        acc_a_ref[...] += audio_ref[...].astype(jnp.float32)

    # Text: sublane-axis reduce; accumulator is already lane-major in Ct so it
    # feeds the wt matmul with no relayout.
    def _acc_text():
        acc_t_ref[...] += jnp.sum(text_ref[...].astype(jnp.float32), axis=1)

    if n_hw == n_red:          # audio chunks cover every reduction step
        _acc_audio()
    else:
        pl.when(k < n_hw)(_acc_audio)

    if n_s == n_red:           # text chunks cover every reduction step
        _acc_text()
    else:
        pl.when(k < n_s)(_acc_text)

    # ---- finalize: one lane reduce, scale once, bf16 GEMVs on the MXU ----
    @pl.when(k == n_red - 1)
    def _finalize():
        E = emb_dim
        audio_sum = jnp.sum(acc_a_ref[...], axis=-1)          # single XLU reduce
        audio_mean = (audio_sum * inv_hw).astype(jnp.bfloat16)
        text_mean = (acc_t_ref[...] * inv_s).astype(jnp.bfloat16)
        melody = melody_ref[...].astype(jnp.bfloat16)

        audio_emb = jnp.dot(audio_mean, wa_ref[...],
                            preferred_element_type=jnp.float32) + ba_ref[...]
        melody_emb = jnp.dot(melody, wm_ref[...],
                             preferred_element_type=jnp.float32) + bm_ref[...]
        text_emb = jnp.dot(text_mean, wt_ref[...],
                           preferred_element_type=jnp.float32) + bt_ref[...]

        out_ref[:, 0:E] = audio_emb.astype(out_ref.dtype)
        out_ref[:, E:2 * E] = melody_emb.astype(out_ref.dtype)
        out_ref[:, 2 * E:3 * E] = text_emb.astype(out_ref.dtype)


# ---------------------------------------------------------------------------
# Tiling helpers
# ---------------------------------------------------------------------------
def _round_up(x, m):
    return ((x + m - 1) // m) * m


def _pick_red_tile(total, align, max_tile):
    """Largest `align`-aligned divisor of `total` that is <= max_tile.

    Falls back to the full extent when no aligned divisor exists (always
    exact); the caller checks the resulting VMEM footprint explicitly.
    """
    if total <= max_tile:
        return total
    t = (max_tile // align) * align
    while t >= align:
        if total % t == 0:
            return t
        t -= align
    return total


def _rebalance(total, align, cur_tile, n_target):
    """Shrink a tile so its chunk count moves toward n_target (never past it).

    Keeps the per-step DMA bytes of the two streams roughly even so the
    pipeline stays full instead of having a single-stream tail.
    """
    cur_n = total // cur_tile
    if cur_n >= n_target:
        return cur_tile
    cap = max(align, _round_up(-(-total // n_target), align))
    cand = _pick_red_tile(total, align, cap)
    if cur_n < (total // cand) <= n_target:
        return cand
    return cur_tile


def _vmem_limit_bytes():
    """Generation-aware VMEM budget (v5e/v6e: 128 MiB, v7x: 64 MiB per TC)."""
    cap = 0
    try:
        cap = int(pltpu.get_tpu_info().vmem_capacity_bytes)
    except Exception:
        cap = 0
    if cap <= 0:
        cap = 64 * 1024 * 1024          # conservative fallback (v7x per-TC)
    return min((cap * 4) // 5, 100 * 1024 * 1024)


# ---------------------------------------------------------------------------
# Wrapper
# ---------------------------------------------------------------------------
def clamp_forward(audio_hidden_nchw, melody_embedding, text_hidden, params,
                  *, batch_tile=32):
    """audio_hidden_nchw: (B, Ca, H, W); melody: (B, 32); text: (B, S, Ct)."""
    B, Ca, H, W = audio_hidden_nchw.shape
    _, S, Ct = text_hidden.shape
    melody_dim = melody_embedding.shape[1]
    E = params["wa"].shape[1]
    assert E % 128 == 0, "embedding_dim must be a multiple of 128 (lane-aligned)"

    HW = H * W
    audio_flat = audio_hidden_nchw.reshape(B, Ca, HW)     # contiguous reshape

    # ---- batch tiling: >=2 tiles whenever possible (v7x second TensorCore) --
    B8 = _round_up(B, 8)
    TB = max(8, min(_round_up(batch_tile, 8), B8))
    if B8 > 8 and TB >= B8:
        TB = _round_up(B8 // 2, 8)
    B_pad = _round_up(B, TB)
    if B_pad != B:
        pad = B_pad - B
        audio_flat = jnp.pad(audio_flat, ((0, pad), (0, 0), (0, 0)))
        melody_embedding = jnp.pad(melody_embedding, ((0, pad), (0, 0)))
        text_hidden = jnp.pad(text_hidden, ((0, pad), (0, 0), (0, 0)))
    n_b = B_pad // TB

    # ---- VMEM budget -> streamed tile sizes (explicit footprint formula) ----
    ia = audio_flat.dtype.itemsize
    it = text_hidden.dtype.itemsize
    im = melody_embedding.dtype.itemsize
    iw = params["wa"].dtype.itemsize

    vmem_limit = _vmem_limit_bytes()
    tile_budget = (vmem_limit * 17) // 20            # headroom for compiler scratch

    fixed_bytes = (
        (Ca + melody_dim + Ct) * E * iw               # weights, single-buffered
        + 3 * 8 * E * 4                               # biases (sublane-padded)
        + 2 * TB * _round_up(melody_dim, 128) * im    # melody block (2 buffers)
        + 2 * TB * 3 * E * 4                          # output block (2 buffers)
        + TB * _round_up(Ct, 128) * 4)                # text accumulator
    stream_budget = max(tile_budget - fixed_bytes, 0)

    audio_total = Ca * HW * ia
    text_total = S * Ct * it
    audio_frac = audio_total / float(max(audio_total + text_total, 1))

    per_thw = TB * Ca * (2 * ia + 4)   # 2 streamed buffers + f32 accumulator column
    per_ts = TB * Ct * 2 * it          # 2 streamed buffers

    max_thw = max(int(stream_budget * audio_frac) // per_thw, 128)
    max_ts = max(int(stream_budget * (1.0 - audio_frac)) // per_ts, 8)

    THW = _pick_red_tile(HW, 128, max_thw)   # lane axis of the audio block
    TS = _pick_red_tile(S, 8, max_ts)        # sublane axis of the text block

    # Co-tune so both streams finish on (roughly) the same step.
    n_red = max(HW // THW, S // TS)
    THW = _rebalance(HW, 128, THW, n_red)
    TS = _rebalance(S, 8, TS, n_red)
    n_hw, n_s = HW // THW, S // TS
    n_red = max(n_hw, n_s)

    # Explicit footprint check (divisor fallback must never silently overflow).
    footprint = (fixed_bytes
                 + TB * Ca * THW * (2 * ia + 4)
                 + 2 * TB * TS * Ct * it)
    if footprint > vmem_limit:
        raise ValueError(
            f"CLaMP kernel tile footprint {footprint / 2**20:.1f} MiB exceeds the "
            f"VMEM budget {vmem_limit / 2**20:.1f} MiB (HW={HW}, S={S} admit no "
            f"small aligned divisors); reduce batch_tile or pad HW/S.")

    if n_hw == n_red:
        audio_map = lambda b, k: (b, 0, k)
    else:
        audio_map = lambda b, k: (b, 0, jnp.minimum(k, n_hw - 1))
    if n_s == n_red:
        text_map = lambda b, k: (b, k, 0)
    else:
        text_map = lambda b, k: (b, jnp.minimum(k, n_s - 1), 0)

    kernel = functools.partial(
        clamp_kernel, n_hw=n_hw, n_s=n_s, n_red=n_red,
        inv_hw=float(1.0 / HW), inv_s=float(1.0 / S), emb_dim=E)

    args = (
        audio_flat, melody_embedding, text_hidden,
        params["wa"], params["ba"],
        params["wm"], params["bm"],
        params["wt"], params["bt"],
    )

    resident = dict(pipeline_mode=pl.Buffered(1))   # fetched once; single buffer
    in_specs = [
        pl.BlockSpec((TB, Ca, THW), audio_map),
        pl.BlockSpec((TB, melody_dim), lambda b, k: (b, 0)),
        pl.BlockSpec((TB, TS, Ct), text_map),
        # Weights/biases: constant block index -> single-buffered residents.
        pl.BlockSpec((Ca, E), lambda b, k: (0, 0), **resident),
        pl.BlockSpec((1, E), lambda b, k: (0, 0), **resident),
        pl.BlockSpec((melody_dim, E), lambda b, k: (0, 0), **resident),
        pl.BlockSpec((1, E), lambda b, k: (0, 0), **resident),
        pl.BlockSpec((Ct, E), lambda b, k: (0, 0), **resident),
        pl.BlockSpec((1, E), lambda b, k: (0, 0), **resident),
    ]
    out_specs = pl.BlockSpec((TB, 3 * E), lambda b, k: (b, 0))

    bytes_accessed = sum(int(a.size) * a.dtype.itemsize for a in args)
    bytes_accessed += B_pad * 3 * E * 4
    flops = (B_pad * Ca * HW + B_pad * S * Ct                 # mean reductions
             + 2 * B_pad * E * (Ca + melody_dim + Ct))        # three GEMVs

    out = pl.pallas_call(
        kernel,
        out_shape=jax.ShapeDtypeStruct((B_pad, 3 * E), jnp.float32),
        grid_spec=pltpu.PrefetchScalarGridSpec(
            num_scalar_prefetch=0,
            grid=(n_b, n_red),
            in_specs=in_specs,
            out_specs=out_specs,
            scratch_shapes=[pltpu.VMEM((TB, Ca, THW), jnp.float32),
                            pltpu.VMEM((TB, Ct), jnp.float32)]),
        compiler_params=pltpu.CompilerParams(
            dimension_semantics=("parallel", "arbitrary"),
            vmem_limit_bytes=int(vmem_limit)),
        cost_estimate=pl.CostEstimate(
            flops=int(flops), transcendentals=0,
            bytes_accessed=int(bytes_accessed)),
    )(*args)

    return out[:B]


# ---------------------------------------------------------------------------
# Params / reference
# ---------------------------------------------------------------------------
def init_params(key, audio_hidden, text_hidden, embedding_dim):
    """nn.Linear-style init; weights stored bf16 (MXU-native), biases f32."""
    ks = jax.random.split(key, 6)

    def lin(kw, kb, fan_in, fan_out):
        bound = 1.0 / (fan_in ** 0.5)
        w = jax.random.uniform(kw, (fan_in, fan_out), jnp.float32, -bound, bound)
        b = jax.random.uniform(kb, (1, fan_out), jnp.float32, -bound, bound)
        return w.astype(jnp.bfloat16), b

    wa, ba = lin(ks[0], ks[1], audio_hidden, embedding_dim)
    wm, bm = lin(ks[2], ks[3], 32, embedding_dim)
    wt, bt = lin(ks[4], ks[5], text_hidden, embedding_dim)
    return {"wa": wa, "ba": ba, "wm": wm, "bm": bm, "wt": wt, "bt": bt}


def clamp_reference(audio_hidden_nchw, melody_embedding, text_hidden, params):
    """Pure-JAX reference mirroring the kernel's bf16 operand quantization."""
    f32 = jnp.float32
    bf16 = jnp.bfloat16
    wa = params["wa"].astype(f32)
    wm = params["wm"].astype(f32)
    wt = params["wt"].astype(f32)

    audio_mean = jnp.mean(audio_hidden_nchw.astype(f32), axis=(-2, -1))
    audio_emb = audio_mean.astype(bf16).astype(f32) @ wa + params["ba"]

    melody_emb = melody_embedding.astype(bf16).astype(f32) @ wm + params["bm"]

    text_mean = jnp.mean(text_hidden.astype(f32), axis=1)
    text_emb = text_mean.astype(bf16).astype(f32) @ wt + params["bt"]

    return jnp.concatenate([audio_emb, melody_emb, text_emb], axis=1)


if __name__ == "__main__":
    # Small, CLaMP-consistent shapes.
    B = 2                # batch
    AUDIO_HIDDEN = 8     # audio_model.config.hidden_size (small synthetic)
    H, W = 4, 4          # audio last_hidden_state spatial dims
    TEXT_HIDDEN = 16     # text_model.config.hidden_size (small synthetic)
    SEQ = 8              # text sequence length
    MELODY_DIM = 32      # fixed by nn.Linear(32, embedding_dim)
    EMB = 128            # embedding_dim (lane-aligned stand-in for 512)

    key = jax.random.PRNGKey(0)
    k_a, k_m, k_t, k_p = jax.random.split(key, 4)

    # TODO(synk): in the full model these come from the CLAP audio backbone /
    # text transformer (last_hidden_state); they are fed in bf16 to halve the
    # dominant input DMA, accumulation stays f32 inside the kernel.
    audio_hidden = jax.random.normal(
        k_a, (B, AUDIO_HIDDEN, H, W), jnp.float32).astype(jnp.bfloat16)
    melody_embedding = jax.random.normal(k_m, (B, MELODY_DIM), jnp.float32)
    text_hidden = jax.random.normal(
        k_t, (B, SEQ, TEXT_HIDDEN), jnp.float32).astype(jnp.bfloat16)

    params = init_params(k_p, AUDIO_HIDDEN, TEXT_HIDDEN, EMB)

    out = clamp_forward(audio_hidden, melody_embedding, text_hidden, params)
    out = jax.block_until_ready(out)

    ref = clamp_reference(audio_hidden, melody_embedding, text_hidden, params)
    assert out.shape == (B, 3 * EMB), out.shape
    assert jnp.allclose(out, ref, atol=2e-2, rtol=2e-2), "mismatch vs reference"

    print("KERNEL_OK")
</pallas_src>

<mosaic_0001>
module attributes {stable_mosaic.version = 11 : i64} {
  func.func @clamp_kernel(%arg0: i32, %arg1: i32, %arg2: memref<8x8x16xbf16, #tpu.memory_space<vmem>>, %arg3: memref<8x32xf32, #tpu.memory_space<vmem>>, %arg4: memref<8x8x16xbf16, #tpu.memory_space<vmem>>, %arg5: memref<8x128xbf16, #tpu.memory_space<vmem>>, %arg6: memref<1x128xf32, #tpu.memory_space<vmem>>, %arg7: memref<32x128xbf16, #tpu.memory_space<vmem>>, %arg8: memref<1x128xf32, #tpu.memory_space<vmem>>, %arg9: memref<16x128xbf16, #tpu.memory_space<vmem>>, %arg10: memref<1x128xf32, #tpu.memory_space<vmem>>, %arg11: memref<8x384xf32, #tpu.memory_space<vmem>>, %arg12: memref<8x8x16xf32, #tpu.memory_space<vmem>>, %arg13: memref<8x16xf32, #tpu.memory_space<vmem>>) attributes {dimension_semantics = [#tpu.dimension_semantics<parallel>, #tpu.dimension_semantics<arbitrary>], iteration_bounds = array<i64: 1, 1>, scalar_prefetch = 0 : i64, scratch_operands = 2 : i64, tpu.core_type = #tpu.core_type<tc>, window_params = [{transform_indices = @transform_0, window_bounds = array<i64: 8, 8, 16>}, {transform_indices = @transform_1, window_bounds = array<i64: 8, 32>}, {transform_indices = @transform_2, window_bounds = array<i64: 8, 8, 16>}, {pipeline_mode = #tpu.pipeline_mode<synchronous>, transform_indices = @transform_3, window_bounds = array<i64: 8, 128>}, {pipeline_mode = #tpu.pipeline_mode<synchronous>, transform_indices = @transform_4, window_bounds = array<i64: 1, 128>}, {pipeline_mode = #tpu.pipeline_mode<synchronous>, transform_indices = @transform_5, window_bounds = array<i64: 32, 128>}, {pipeline_mode = #tpu.pipeline_mode<synchronous>, transform_indices = @transform_6, window_bounds = array<i64: 1, 128>}, {pipeline_mode = #tpu.pipeline_mode<synchronous>, transform_indices = @transform_7, window_bounds = array<i64: 16, 128>}, {pipeline_mode = #tpu.pipeline_mode<synchronous>, transform_indices = @transform_8, window_bounds = array<i64: 1, 128>}, {transform_indices = @transform_9, window_bounds = array<i64: 8, 384>}]} {
    %c0_i32 = arith.constant 0 : i32
    %0 = arith.cmpi eq, %arg1, %c0_i32 : i32
    %1 = arith.extui %0 : i1 to i32
    %c0_i32_0 = arith.constant 0 : i32
    %2 = arith.cmpi ne, %1, %c0_i32_0 : i32
    scf.if %2 {
      %cst_18 = arith.constant 0.000000e+00 : f32
      %17 = vector.broadcast %cst_18 : f32 to vector<8x8x16xf32>
      %c0_19 = arith.constant 0 : index
      %c0_20 = arith.constant 0 : index
      %c0_21 = arith.constant 0 : index
      %18 = vector.load %arg12[%c0_19, %c0_20, %c0_21] : memref<8x8x16xf32, #tpu.memory_space<vmem>>, vector<8x8x16xf32>
      tpu.vector_store %arg12[%c0_19, %c0_20, %c0_21], %17 {strides = array<i32>} : memref<8x8x16xf32, #tpu.memory_space<vmem>>, vector<8x8x16xf32>,
      %cst_22 = arith.constant 0.000000e+00 : f32
      %19 = vector.broadcast %cst_22 : f32 to vector<8x16xf32>
      %c0_23 = arith.constant 0 : index
      %c0_24 = arith.constant 0 : index
      %20 = vector.load %arg13[%c0_23, %c0_24] : memref<8x16xf32, #tpu.memory_space<vmem>>, vector<8x16xf32>
      tpu.vector_store %arg13[%c0_23, %c0_24], %19 {strides = array<i32>} : memref<8x16xf32, #tpu.memory_space<vmem>>, vector<8x16xf32>,
    } else {
    }
    %c0 = arith.constant 0 : index
    %c0_1 = arith.constant 0 : index
    %c0_2 = arith.constant 0 : index
    %3 = vector.load %arg12[%c0, %c0_1, %c0_2] : memref<8x8x16xf32, #tpu.memory_space<vmem>>, vector<8x8x16xf32>
    %c0_3 = arith.constant 0 : index
    %c0_4 = arith.constant 0 : index
    %c0_5 = arith.constant 0 : index
    %4 = vector.load %arg2[%c0_3, %c0_4, %c0_5] : memref<8x8x16xbf16, #tpu.memory_space<vmem>>, vector<8x8x16xbf16>
    %5 = arith.extf %4 : vector<8x8x16xbf16> to vector<8x8x16xf32>
    %6 = arith.addf %3, %5 : vector<8x8x16xf32>
    %c0_6 = arith.constant 0 : index
    %c0_7 = arith.constant 0 : index
    %c0_8 = arith.constant 0 : index
    %7 = vector.load %arg12[%c0_6, %c0_7, %c0_8] : memref<8x8x16xf32, #tpu.memory_space<vmem>>, vector<8x8x16xf32>
    tpu.vector_store %arg12[%c0_6, %c0_7, %c0_8], %6 {strides = array<i32>} : memref<8x8x16xf32, #tpu.memory_space<vmem>>, vector<8x8x16xf32>,
    %c0_9 = arith.constant 0 : index
    %c0_10 = arith.constant 0 : index
    %8 = vector.load %arg13[%c0_9, %c0_10] : memref<8x16xf32, #tpu.memory_space<vmem>>, vector<8x16xf32>
    %c0_11 = arith.constant 0 : index
    %c0_12 = arith.constant 0 : index
    %c0_13 = arith.constant 0 : index
    %9 = vector.load %arg4[%c0_11, %c0_12, %c0_13] : memref<8x8x16xbf16, #tpu.memory_space<vmem>>, vector<8x8x16xbf16>
    %10 = arith.extf %9 : vector<8x8x16xbf16> to vector<8x8x16xf32>
    %cst = arith.constant dense<0.000000e+00> : vector<8x16xf32>
    %11 = vector.multi_reduction <add>, %10, %cst [1] : vector<8x8x16xf32> to vector<8x16xf32>
    %12 = arith.addf %8, %11 : vector<8x16xf32>
    %c0_14 = arith.constant 0 : index
    %c0_15 = arith.constant 0 : index
    %13 = vector.load %arg13[%c0_14, %c0_15] : memref<8x16xf32, #tpu.memory_space<vmem>>, vector<8x16xf32>
    tpu.vector_store %arg13[%c0_14, %c0_15], %12 {strides = array<i32>} : memref<8x16xf32, #tpu.memory_space<vmem>>, vector<8x16xf32>,
    %c0_i32_16 = arith.constant 0 : i32
    %14 = arith.cmpi eq, %arg1, %c0_i32_16 : i32
    %15 = arith.extui %14 : i1 to i32
    %c0_i32_17 = arith.constant 0 : i32
    %16 = arith.cmpi ne, %15, %c0_i32_17 : i32
    scf.if %16 {
      %c0_18 = arith.constant 0 : index
      %c0_19 = arith.constant 0 : index
      %c0_20 = arith.constant 0 : index
      %17 = vector.load %arg12[%c0_18, %c0_19, %c0_20] : memref<8x8x16xf32, #tpu.memory_space<vmem>>, vector<8x8x16xf32>
      %cst_21 = arith.constant dense<0.000000e+00> : vector<8x8xf32>
      %18 = vector.multi_reduction <add>, %17, %cst_21 [2] : vector<8x8x16xf32> to vector<8x8xf32>
      %cst_22 = arith.constant 6.250000e-02 : f32
      %19 = vector.broadcast %cst_22 : f32 to vector<8x8xf32>
      %20 = arith.mulf %18, %19 : vector<8x8xf32>
      %21 = arith.truncf %20 : vector<8x8xf32> to vector<8x8xbf16>
      %c0_23 = arith.constant 0 : index
      %c0_24 = arith.constant 0 : index
      %22 = vector.load %arg13[%c0_23, %c0_24] : memref<8x16xf32, #tpu.memory_space<vmem>>, vector<8x16xf32>
      %cst_25 = arith.constant 1.250000e-01 : f32
      %23 = vector.broadcast %cst_25 : f32 to vector<8x16xf32>
      %24 = arith.mulf %22, %23 : vector<8x16xf32>
      %25 = arith.truncf %24 : vector<8x16xf32> to vector<8x16xbf16>
      %c0_26 = arith.constant 0 : index
      %c0_27 = arith.constant 0 : index
      %26 = vector.load %arg3[%c0_26, %c0_27] : memref<8x32xf32, #tpu.memory_space<vmem>>, vector<8x32xf32>
      %27 = arith.truncf %26 : vector<8x32xf32> to vector<8x32xbf16>
      %c0_28 = arith.constant 0 : index
      %c0_29 = arith.constant 0 : index
      %28 = vector.load %arg5[%c0_28, %c0_29] : memref<8x128xbf16, #tpu.memory_space<vmem>>, vector<8x128xbf16>
      %cst_30 = arith.constant dense<0.000000e+00> : vector<8x128xf32>
      %29 = tpu.matmul %21, %28, %cst_30 {dimension_numbers = #tpu.dot_dimension_numbers<[1], [0], [0], [1], [0, 0, 1, 1], [], []>} : vector<8x8xbf16>, vector<8x128xbf16>, vector<8x128xf32> -> vector<8x128xf32>
      %c0_31 = arith.constant 0 : index
      %c0_32 = arith.constant 0 : index
      %30 = vector.load %arg6[%c0_31, %c0_32] : memref<1x128xf32, #tpu.memory_space<vmem>>, vector<1x128xf32>
      %31 = vector.broadcast %30 : vector<1x128xf32> to vector<8x128xf32>
      %32 = arith.addf %29, %31 : vector<8x128xf32>
      %c0_33 = arith.constant 0 : index
      %c0_34 = arith.constant 0 : index
      %33 = vector.load %arg7[%c0_33, %c0_34] : memref<32x128xbf16, #tpu.memory_space<vmem>>, vector<32x128xbf16>
      %cst_35 = arith.constant dense<0.000000e+00> : vector<8x128xf32>
      %34 = tpu.matmul %27, %33, %cst_35 {dimension_numbers = #tpu.dot_dimension_numbers<[1], [0], [0], [1], [0, 0, 1, 1], [], []>} : vector<8x32xbf16>, vector<32x128xbf16>, vector<8x128xf32> -> vector<8x128xf32>
      %c0_36 = arith.constant 0 : index
      %c0_37 = arith.constant 0 : index
      %35 = vector.load %arg8[%c0_36, %c0_37] : memref<1x128xf32, #tpu.memory_space<vmem>>, vector<1x128xf32>
      %36 = vector.broadcast %35 : vector<1x128xf32> to vector<8x128xf32>
      %37 = arith.addf %34, %36 : vector<8x128xf32>
      %c0_38 = arith.constant 0 : index
      %c0_39 = arith.constant 0 : index
      %38 = vector.load %arg9[%c0_38, %c0_39] : memref<16x128xbf16, #tpu.memory_space<vmem>>, vector<16x128xbf16>
      %cst_40 = arith.constant dense<0.000000e+00> : vector<8x128xf32>
      %39 = tpu.matmul %25, %38, %cst_40 {dimension_numbers = #tpu.dot_dimension_numbers<[1], [0], [0], [1], [0, 0, 1, 1], [], []>} : vector<8x16xbf16>, vector<16x128xbf16>, vector<8x128xf32> -> vector<8x128xf32>
      %c0_41 = arith.constant 0 : index
      %c0_42 = arith.constant 0 : index
      %40 = vector.load %arg10[%c0_41, %c0_42] : memref<1x128xf32, #tpu.memory_space<vmem>>, vector<1x128xf32>
      %41 = vector.broadcast %40 : vector<1x128xf32> to vector<8x128xf32>
      %42 = arith.addf %39, %41 : vector<8x128xf32>
      %c0_43 = arith.constant 0 : index
      %c0_44 = arith.constant 0 : index
      %43 = vector.load %arg11[%c0_43, %c0_44] : memref<8x384xf32, #tpu.memory_space<vmem>>, vector<8x128xf32>
      tpu.vector_store %arg11[%c0_43, %c0_44], %32 {strides = array<i32>} : memref<8x384xf32, #tpu.memory_space<vmem>>, vector<8x128xf32>,
      %c0_45 = arith.constant 0 : index
      %c128 = arith.constant 128 : index
      %44 = vector.load %arg11[%c0_45, %c128] : memref<8x384xf32, #tpu.memory_space<vmem>>, vector<8x128xf32>
      tpu.vector_store %arg11[%c0_45, %c128], %37 {strides = array<i32>} : memref<8x384xf32, #tpu.memory_space<vmem>>, vector<8x128xf32>,
      %c0_46 = arith.constant 0 : index
      %c256 = arith.constant 256 : index
      %45 = vector.load %arg11[%c0_46, %c256] : memref<8x384xf32, #tpu.memory_space<vmem>>, vector<8x128xf32>
      tpu.vector_store %arg11[%c0_46, %c256], %42 {strides = array<i32>} : memref<8x384xf32, #tpu.memory_space<vmem>>, vector<8x128xf32>,
    } else {
    }
    return
  }
  func.func @transform_0(%arg0: i32, %arg1: i32) -> (i32, i32, i32) {
    %c0_i32 = arith.constant 0 : i32
    %c0_i32_0 = arith.constant 0 : i32
    return %arg0, %c0_i32, %arg1 : i32, i32, i32
  }
  func.func @transform_1(%arg0: i32, %arg1: i32) -> (i32, i32) {
    %c0_i32 = arith.constant 0 : i32
    %c0_i32_0 = arith.constant 0 : i32
    return %arg0, %c0_i32 : i32, i32
  }
  func.func @transform_2(%arg0: i32, %arg1: i32) -> (i32, i32, i32) {
    %c0_i32 = arith.constant 0 : i32
    %c0_i32_0 = arith.constant 0 : i32
    return %arg0, %arg1, %c0_i32 : i32, i32, i32
  }
  func.func @transform_3(%arg0: i32, %arg1: i32) -> (i32, i32) {
    %c0_i32 = arith.constant 0 : i32
    %c0_i32_0 = arith.constant 0 : i32
    %c0_i32_1 = arith.constant 0 : i32
    return %c0_i32, %c0_i32_0 : i32, i32
  }
  func.func @transform_4(%arg0: i32, %arg1: i32) -> (i32, i32) {
    %c0_i32 = arith.constant 0 : i32
    %c0_i32_0 = arith.constant 0 : i32
    %c0_i32_1 = arith.constant 0 : i32
    return %c0_i32, %c0_i32_0 : i32, i32
  }
  func.func @transform_5(%arg0: i32, %arg1: i32) -> (i32, i32) {
    %c0_i32 = arith.constant 0 : i32
    %c0_i32_0 = arith.constant 0 : i32
    %c0_i32_1 = arith.constant 0 : i32
    return %c0_i32, %c0_i32_0 : i32, i32
  }
  func.func @transform_6(%arg0: i32, %arg1: i32) -> (i32, i32) {
    %c0_i32 = arith.constant 0 : i32
    %c0_i32_0 = arith.constant 0 : i32
    %c0_i32_1 = arith.constant 0 : i32
    return %c0_i32, %c0_i32_0 : i32, i32
  }
  func.func @transform_7(%arg0: i32, %arg1: i32) -> (i32, i32) {
    %c0_i32 = arith.constant 0 : i32
    %c0_i32_0 = arith.constant 0 : i32
    %c0_i32_1 = arith.constant 0 : i32
    return %c0_i32, %c0_i32_0 : i32, i32
  }
  func.func @transform_8(%arg0: i32, %arg1: i32) -> (i32, i32) {
    %c0_i32 = arith.constant 0 : i32
    %c0_i32_0 = arith.constant 0 : i32
    %c0_i32_1 = arith.constant 0 : i32
    return %c0_i32, %c0_i32_0 : i32, i32
  }
  func.func @transform_9(%arg0: i32, %arg1: i32) -> (i32, i32) {
    %c0_i32 = arith.constant 0 : i32
    %c0_i32_0 = arith.constant 0 : i32
    return %arg0, %c0_i32 : i32, i32
  }
}

</mosaic_0001>

<bundles_post_ra>
// kernel: tpu_custom_call.1
= control target key start
LH: loop header
LB: loop body
LE: loop exit
PB: predicated region body
PF: predicated region fallthrough
CT: control target
= control target key end

     0   :  { %14 = vsyncpa [#allocation5], 0  ;;  %s976_s0 = inlined_call_operand.hbm [shape: bf16[8,8,16], index: 0, kind: input, shape index: {}]   ;;  %s977_s1 = inlined_call_operand.hbm [shape: f32[8,32], index: 1, kind: input, shape index: {}]   ;;  %s978_s2 = inlined_call_operand.hbm [shape: bf16[8,8,16], index: 2, kind: input, shape index: {}]   ;;  %s979_s3 = inlined_call_operand.vmem [shape: bf16[8,128], index: 3, kind: input, shape index: {}]   ;;  %s980_s4 = inlined_call_operand.hbm [shape: f32[1,128], index: 4, kind: input, shape index: {}]   ;;  %s981_s5 = inlined_call_operand.hbm [shape: bf16[32,128], index: 5, kind: input, shape index: {}]   ;;  %s982_s6 = inlined_call_operand.hbm [shape: f32[1,128], index: 6, kind: input, shape index: {}]   ;;  %s983_s7 = inlined_call_operand.vmem [shape: bf16[16,128], index: 7, kind: input, shape index: {}]   ;;  %s984_s8 = inlined_call_operand.vmem [shape: f32[1,128], index: 8, kind: input, shape index: {}]   ;;  %s985_s9 = inlined_call_operand.hbm [shape: f32[8,384], index: 9, kind: output, shape index: {}]  }
   0x1   :  { %15 = vsyncpa [#allocation8], 0 }
   0x2   :  { %16 = vsyncpa [#allocation11], 0 }
   0x3   :  { %17 = vsyncpa [#allocation14], 0 }
   0x4   :  { %18 = vsyncpa [#allocation6], 0  ;;  %s817_s30 = smov [#allocation7]   ;;  %s818_s11 = smov [#allocation10]  }
   0x5   :  { %s37_s10 = sshll.u32 %s817_s30, 4  ;;  %s61_s12 = sshll.u32 %s818_s11, 4  ;;  %s38_s10 = int_to_ptr.vmem [resolvable:$true] %s37_s10  ;;  %s62_s12 = int_to_ptr.vmem [resolvable:$true] %s61_s12 }
   0x6   :  { %s675_s13 = scalar_lea.vmem %s38_s10, 128  ;;  %p680_p1 = scmp.lt.s32.totalorder %s38_s10, %s38_s10 }
   0x7   :  { %p676_p0 = scmp.ne.s32.totalorder %s38_s10, %s675_s13  ;;  %p681_p2 = scmp.lt.s32.totalorder %s675_s13, %s675_s13 }
   0x9   :  { %p682_p3 = por %p681_p2, %p680_p1 }
   0xb   :  { %p683_p4 = pnand %p682_p3, %p676_p0 }
   0xd   :  { %686 = shalt.err (!%p683_p4)
}
   0xe   :  { %40 = dma.hbm_to_vmem [thread:$0]  %s977_s1, 128, %s38_s10, [#allocation8]  }
   0xf   :  { %s695_s16 = scalar_lea.vmem %s62_s12, 16  ;;  %s699_s17 = scalar_lea.vmem %s62_s12, 32 }
  0x10   :  { %p696_p5 = scmp.ne.s32.totalorder %s62_s12, %s695_s16  ;;  %p700_p6 = scmp.lt.s32.totalorder %s62_s12, %s62_s12 }
  0x11   :  { %p701_p7 = scmp.lt.s32.totalorder %s699_s17, %s695_s16 }
  0x13   :  { %p702_p8 = por %p701_p7, %p700_p6 }
  0x15   :  { %p703_p9 = pnand %p702_p8, %p696_p5 }
  0x17   :  { %706 = shalt.err (!%p703_p9)
}
  0x18   :  { %64 = dma.hbm_to_vmem [thread:$0]  %s980_s4, 16, %s62_s12, [#allocation11]  }
  0x19   :  { %s819_s20 = smov [#allocation4]  }
  0x1a   :  { %s24_s21 = sshll.u32 %s819_s20, 4  ;;  %s25_s21 = int_to_ptr.vmem [resolvable:$true] %s24_s21 }
  0x1b   :  { %s715_s22 = scalar_lea.vmem %s25_s21, 512  ;;  %p720_p11 = scmp.lt.s32.totalorder %s25_s21, %s25_s21 }
  0x1c   :  { %p716_p10 = scmp.ne.s32.totalorder %s25_s21, %s715_s22  ;;  %p721_p12 = scmp.lt.s32.totalorder %s715_s22, %s715_s22 }
  0x1e   :  { %p722_p13 = por %p721_p12, %p720_p11 }
  0x20   :  { %p723_p0 = pnand %p722_p13, %p716_p10 }
  0x22   :  { %726 = shalt.err (!%p723_p0)
}
  0x23   :  { %s820_s1 = smov 64   ;;  %s821_s23 = smov 4  }
  0x24   :  { %30 = dma.hbm_to_vmem [thread:$0]  %s976_s0, 512, %s25_s21, [#allocation5], %s820_s1, %s820_s1, %s821_s23  }
  0x25   :  { %s822_s26 = smov [#allocation9]   ;;  %s823_s4 = smov [#allocation12]  }
  0x26   :  { %s46_s27 = sshll.u32 %s822_s26, 4  ;;  %s70_s28 = sshll.u32 %s823_s4, 4  ;;  %s47_s27 = int_to_ptr.vmem [resolvable:$true] %s46_s27  ;;  %s71_s28 = int_to_ptr.vmem [resolvable:$true] %s70_s28 }
  0x27   :  { %s735_s29 = scalar_lea.vmem %s47_s27, 512  ;;  %p740_p2 = scmp.lt.s32.totalorder %s47_s27, %s47_s27 }
  0x28   :  { %p736_p1 = scmp.ne.s32.totalorder %s47_s27, %s735_s29  ;;  %p741_p3 = scmp.lt.s32.totalorder %s735_s29, %s735_s29 }
  0x2a   :  { %p742_p4 = por %p741_p3, %p740_p2 }
  0x2c   :  { %p743_p5 = pnand %p742_p4, %p736_p1 }
  0x2e   :  { %746 = shalt.err (!%p743_p5)
}
  0x2f   :  { %52 = dma.hbm_to_vmem [thread:$0]  %s978_s2, 512, %s47_s27, [#allocation8], %s820_s1, %s820_s1, %s821_s23  }
  0x30   :  { %s755_s11 = scalar_lea.vmem %s71_s28, 256  ;;  %p760_p7 = scmp.lt.s32.totalorder %s71_s28, %s71_s28 }
  0x31   :  { %p756_p6 = scmp.ne.s32.totalorder %s71_s28, %s755_s11  ;;  %p761_p8 = scmp.lt.s32.totalorder %s755_s11, %s755_s11 }
  0x33   :  { %p762_p9 = por %p761_p8, %p760_p7 }
  0x35   :  { %p763_p10 = pnand %p762_p9, %p756_p6 }
  0x37   :  { %766 = shalt.err (!%p763_p10)
}
  0x38   :  { %76 = dma.hbm_to_vmem [thread:$0]  %s981_s5, 256, %s71_s28, [#allocation11], %s820_s1, %s820_s1, %s821_s23  }
  0x39   :  { %s824_s13 = smov [#allocation13]  }
  0x3a   :  { %s83_s14 = sshll.u32 %s824_s13, 4  ;;  %s84_s14 = int_to_ptr.vmem [resolvable:$true] %s83_s14 }
  0x3b   :  { %s775_s15 = scalar_lea.vmem %s84_s14, 16  ;;  %s779_s16 = scalar_lea.vmem %s84_s14, 32 }
  0x3c   :  { %p776_p11 = scmp.ne.s32.totalorder %s84_s14, %s775_s15  ;;  %p780_p12 = scmp.lt.s32.totalorder %s84_s14, %s84_s14 }
  0x3d   :  { %p781_p13 = scmp.lt.s32.totalorder %s779_s16, %s775_s15 }
  0x3f   :  { %p782_p0 = por %p781_p13, %p780_p12 }
  0x41   :  { %p783_p1 = pnand %p782_p0, %p776_p11 }
  0x43   :  { %786 = shalt.err (!%p783_p1)
}
  0x44   :  { %86 = dma.hbm_to_vmem [thread:$0]  %s982_s6, 16, %s84_s14, [#allocation14]  }
  0x45   :  { %807 = dma.done.wait [#allocation5], 512  }
  0x46   :  { %808 = vsyncadd [#allocation5], 4294966784 }
  0x47   :  { %809 = dma.done.wait [#allocation8], 640  }
  0x48   :  { %810 = vsyncadd [#allocation8], 4294966656 }
  0x49   :  { %811 = dma.done.wait [#allocation11], 272  }
  0x4a   :  { %812 = vsyncadd [#allocation11], 4294967024 }
  0x4b   :  { %813 = dma.done.wait [#allocation14], 16  }
  0x4c   :  { %814 = vsyncadd [#allocation14], 4294967280  ;;  %vm114_vm0 = vcmask 130048   ;;  %v825_v0 = vmov 0.0   ;;  %v589_v1 = vld [vmem:[#allocation4] sm:$0xff]   ;;  %v620_v2 = vld [vmem:[#allocation4 + $0x8] sm:$0xff]  }
  0x4d   :  { %115 = vst.msk [vmem:[#allocation2] sm:$0xff] %vm114_vm0, %v825_v0  ;;  %116 = vst.msk [vmem:[#allocation2 + $0x8] sm:$0xff] %vm114_vm0, %v825_v0  ;;  %639 = vmatprep.subr.bf16.mxu1 %v825_v0  ;;  %633 = vmatprep.subr.bf16.mxu0 %v825_v0  ;;  %v621_v3 = vld [vmem:[#allocation4 + $0x10] sm:$0xff]   ;;  %v590_v5 = vunpack.c.l.bf16 %v589_v1  ;;  %v594_v7 = vunpack.c.l.bf16 %v620_v2  ;;  %v591_v9 = vunpack.c.h.bf16 %v589_v1  ;;  %v595_v10 = vunpack.c.h.bf16 %v620_v2  ;;  %v622_v21 = vld [vmem:[#allocation4 + $0x18] sm:$0xff]   ;;  %s827_s20 = smov [#allocation15]  }
  0x4e   :  { %117 = vst.msk [vmem:[#allocation2 + $0x10] sm:$0xff] %vm114_vm0, %v825_v0  ;;  %118 = vst.msk [vmem:[#allocation2 + $0x18] sm:$0xff] %vm114_vm0, %v825_v0  ;;  %v598_v13 = vunpack.c.l.bf16 %v621_v3  ;;  %v599_v15 = vunpack.c.h.bf16 %v621_v3  ;;  %v602_v25 = vunpack.c.l.bf16 %v622_v21  ;;  %v603_v26 = vunpack.c.h.bf16 %v622_v21  ;;  %v605_v43 = vld [vmem:[#allocation9] sm:$0xff]   ;;  %v623_v46 = vld [vmem:[#allocation9 + $0x8] sm:$0xff]   ;;  %s567_s21 = sshll.u32 %s827_s20, 4  ;;  %s568_s21 = int_to_ptr.vmem [resolvable:$true] %s567_s21 }
  0x4f   :  { %119 = vst.msk [vmem:[#allocation2 + $0x20] sm:$0xff] %vm114_vm0, %v825_v0  ;;  %120 = vst.msk [vmem:[#allocation2 + $0x28] sm:$0xff] %vm114_vm0, %v825_v0  ;;  %v606_v44 = vunpack.c.l.bf16 %v605_v43  ;;  %v607_v45 = vunpack.c.h.bf16 %v605_v43  ;;  %v610_v48 = vunpack.c.l.bf16 %v623_v46  ;;  %v611_v52 = vunpack.c.h.bf16 %v623_v46  ;;  %v624_v53 = vld [vmem:[#allocation9 + $0x10] sm:$0xff]   ;;  %v625_v61 = vld [vmem:[#allocation9 + $0x18] sm:$0xff]   ;;  %s787_s22 = scalar_lea.vmem %s568_s21, 384  ;;  %p792_p3 = scmp.lt.s32.totalorder %s568_s21, %s568_s21 }
  0x50   :  { %121 = vst.msk [vmem:[#allocation2 + $0x30] sm:$0xff] %vm114_vm0, %v825_v0  ;;  %122 = vst.msk [vmem:[#allocation2 + $0x38] sm:$0xff] %vm114_vm0, %v825_v0  ;;  %v614_v57 = vunpack.c.l.bf16 %v624_v53  ;;  %v615_v60 = vunpack.c.h.bf16 %v624_v53  ;;  %vm246_vm1 = vcmask 1041409   ;;  %vm248_vm2 = vcmask 1042434   ;;  %v664_v53 = vld [vmem:[#allocation12 + $0x8] sm:$0xff]   ;;  %p788_p2 = scmp.ne.s32.totalorder %s568_s21, %s787_s22  ;;  %p793_p4 = scmp.lt.s32.totalorder %s787_s22, %s787_s22 }
  0x51   :  { %123 = vst.msk [vmem:[#allocation3] sm:$0xff] %vm114_vm0, %v825_v0  ;;  %v182_v50 = vsel %vm114_vm0, %v606_v44, 0.0  ;;  %v189_v51 = vsel %vm114_vm0, %v607_v45, 0.0  ;;  %v196_v56 = vsel %vm114_vm0, %v610_v48, 0.0  ;;  %v203_v59 = vsel %vm114_vm0, %v611_v52, 0.0  ;;  %640 = vmatpush3.bf16.msra.mxu1 %v664_v53  ;;  %v666_v53 = vld [vmem:[%s983_s7] sm:$0xff]  }
  0x52   :  { %v183_v54 = vrot.slane %v182_v50, 4  ;;  %v190_v55 = vrot.slane %v189_v51, 4  ;;  %v197_v58 = vrot.slane %v196_v56, 4  ;;  %v204_v1 = vrot.slane %v203_v59, 4  ;;  %641 = vmatprep.subr.bf16.mxu1 %v825_v0  ;;  %p794_p5 = por %p793_p4, %p792_p3 }
  0x53   :  { %v210_v2 = vsel %vm114_vm0, %v614_v57, 0.0  ;;  %vm250_vm3 = vcmask 1043459   ;;  %vm252_vm4 = vcmask 1044484   ;;  %vm254_vm5 = vcmask 1045509  }
  0x54   :  { %v124_v4 = vld [vmem:[#allocation2] sm:$0xff]  ;;  %v125_v8 = vld [vmem:[#allocation2 + $0x8] sm:$0xff]  ;;  %v184_v62 = vadd.f32 %v183_v54, %v182_v50  ;;  %v191_v63 = vadd.f32 %v190_v55, %v189_v51  ;;  %v198_v3 = vadd.f32 %v197_v58, %v196_v56  ;;  %vm256_vm6 = vcmask 1046534   ;;  %p795_p6 = pnand %p794_p5, %p788_p2 }
  0x55   :  { %v126_v6 = vld [vmem:[#allocation2 + $0x10] sm:$0xff]  ;;  %v127_v11 = vld [vmem:[#allocation2 + $0x18] sm:$0xff]  ;;  %v148_v16 = vadd.f32 %v590_v5, %v124_v4  ;;  %v149_v18 = vadd.f32 %v591_v9, %v125_v8  ;;  %v211_v4 = vrot.slane %v210_v2, 4  ;;  %v217_v5 = vsel %vm114_vm0, %v615_v60, 0.0  ;;  %v319_v55 = vld [vmem:[%s979_s3] sm:$0xf] }
  0x56   :  { %v128_v12 = vld [vmem:[#allocation2 + $0x20] sm:$0xff]  ;;  %v129_v14 = vld [vmem:[#allocation2 + $0x28] sm:$0xff]  ;;  %v150_v17 = vadd.f32 %v594_v7, %v126_v6  ;;  %v151_v19 = vadd.f32 %v595_v10, %v127_v11  ;;  %v618_v6 = vunpack.c.l.bf16 %v625_v61  ;;  %v185_v7 = vrot.slane %v184_v62, 2  ;;  %v665_v60 = vld [vmem:[#allocation12] sm:$0xff]  }
  0x57   :  { %v130_v20 = vld [vmem:[#allocation2 + $0x30] sm:$0xff]  ;;  %v131_v22 = vld [vmem:[#allocation2 + $0x38] sm:$0xff]  ;;  %v152_v23 = vadd.f32 %v598_v13, %v128_v12  ;;  %v153_v24 = vadd.f32 %v599_v15, %v129_v14  ;;  %157 = vst.msk [vmem:[#allocation2] sm:$0xff] %vm114_vm0, %v148_v16  ;;  %158 = vst.msk [vmem:[#allocation2 + $0x8] sm:$0xff] %vm114_vm0, %v149_v18  ;;  %v192_v8 = vrot.slane %v191_v63, 2  ;;  %v205_v9 = vadd.f32 %v204_v1, %v203_v59 }
  0x58   :  { %159 = vst.msk [vmem:[#allocation2 + $0x10] sm:$0xff] %vm114_vm0, %v150_v17  ;;  %160 = vst.msk [vmem:[#allocation2 + $0x18] sm:$0xff] %vm114_vm0, %v151_v19  ;;  %v154_v27 = vadd.f32 %v602_v25, %v130_v20  ;;  %v155_v28 = vadd.f32 %v603_v26, %v131_v22  ;;  %v218_v10 = vrot.slane %v217_v5, 4  ;;  %v199_v11 = vrot.slane %v198_v3, 2  ;;  %v165_v58 = vld [vmem:[#allocation3] sm:$0xff]  ;;  %642 = vmatpush3.bf16.msra.mxu1 %v665_v60 }
  0x59   :  { %161 = vst.msk [vmem:[#allocation2 + $0x20] sm:$0xff] %vm114_vm0, %v152_v23  ;;  %162 = vst.msk [vmem:[#allocation2 + $0x28] sm:$0xff] %vm114_vm0, %v153_v24  ;;  %v212_v12 = vadd.f32 %v211_v4, %v210_v2  ;;  %v224_v13 = vsel %vm114_vm0, %v618_v6, 0.0  ;;  %v619_v14 = vunpack.c.h.bf16 %v625_v61  ;;  %v186_v15 = vadd.f32 %v185_v7, %v184_v62  ;;  %v317_v62 = vld [vmem:[#allocation7] sm:$0xff] }
  0x5a   :  { %163 = vst.msk [vmem:[#allocation2 + $0x30] sm:$0xff] %vm114_vm0, %v154_v27  ;;  %164 = vst.msk [vmem:[#allocation2 + $0x38] sm:$0xff] %vm114_vm0, %v155_v28  ;;  %v193_v16 = vadd.f32 %v192_v8, %v191_v63  ;;  %v206_v17 = vrot.slane %v205_v9, 2  ;;  %v219_v18 = vadd.f32 %v218_v10, %v217_v5  ;;  %v200_v19 = vadd.f32 %v199_v11, %v198_v3 }
  0x5b   :  { %v213_v20 = vrot.slane %v212_v12, 2  ;;  %v225_v21 = vrot.slane %v224_v13, 4  ;;  %v187_v22 = vrot.slane %v186_v15, 1  ;;  %vm389_vm7 = vcmask 1043456  }
  0x5c   :  { %v194_v23 = vrot.slane %v193_v16, 1  ;;  %v207_v24 = vadd.f32 %v206_v17, %v205_v9  ;;  %v220_v25 = vrot.slane %v219_v18, 2  ;;  %v201_v26 = vrot.slane %v200_v19, 1 }
  0x5d   :  { %v214_v27 = vadd.f32 %v213_v20, %v212_v12  ;;  %v226_v28 = vadd.f32 %v225_v21, %v224_v13  ;;  %vm258_vm8 = vcmask 1047559   ;;  %v391_v57 = vsel %vm389_vm7, %v319_v55, 0 }
  0x5e   :  { %v266_v29 = vld [vmem:[#allocation2] sm:$0xff]  ;;  %v267_v31 = vld [vmem:[#allocation2 + $0x8] sm:$0xff]  ;;  %634 = vmatpush3.bf16.msra.mxu0 %v391_v57  ;;  %vm826_vm9 = vmmov 0   ;;  %v318_v1 = vpack.c.bf16 %v317_v62, %v317_v62  ;;  %vm456_vm10 = vcmask 261120   ;;  %v343_v2 = vlaneseq }
  0x5f   :  { %v268_v30 = vld [vmem:[#allocation2 + $0x10] sm:$0xff]  ;;  %v274_v32 = vsel %vm114_vm0, %v266_v29, 0.0  ;;  %v269_v34 = vld [vmem:[#allocation2 + $0x18] sm:$0xff]  ;;  %v277_v35 = vsel %vm114_vm0, %v267_v31, 0.0  ;;  %v231_v29 = vsel %vm114_vm0, %v619_v14, 0.0  ;;  %v195_v31 = vadd.f32 %v194_v23, %v193_v16  ;;  %635 = vmatprep.mubr.msk.bf16.mxu0 %vm826_vm9, %v825_v0  ;;  %647 = vmatprep.subr.bf16.mxu0 %v825_v0 }
  0x60   :  { %v280_v33 = vsel %vm114_vm0, %v268_v30, 0.0  ;;  %275 = vadd.xlane.f32.xlu0 %v274_v32  ;;  %v283_v36 = vsel %vm114_vm0, %v269_v34, 0.0  ;;  %v270_v37 = vld [vmem:[#allocation2 + $0x20] sm:$0xff]  ;;  %v271_v38 = vld [vmem:[#allocation2 + $0x28] sm:$0xff]  ;;  %v188_v30 = vadd.f32 %v187_v22, %v186_v15  ;;  %v208_v32 = vrot.slane %v207_v24, 1  ;;  %643 = vmatprep.mubr.msk.bf16.mxu1 %vm826_vm9, %v825_v0 }
  0x61   :  { %281 = vadd.xlane.f32.xlu1 %v280_v33  ;;  %v272_v39 = vld [vmem:[#allocation2 + $0x30] sm:$0xff]  ;;  %v286_v40 = vsel %vm114_vm0, %v270_v37, 0.0  ;;  %v289_v41 = vsel %vm114_vm0, %v271_v38, 0.0  ;;  %v273_v42 = vld [vmem:[#allocation2 + $0x38] sm:$0xff]  ;;  %v221_v33 = vadd.f32 %v220_v25, %v219_v18  ;;  %v202_v34 = vadd.f32 %v201_v26, %v200_v19  ;;  %644 = vmatmul.mubr.msk.bf16.vlgmr.msra.gmra.mxu1 %vm456_vm10, %v318_v1 }
  0x62   :  { %v292_v47 = vsel %vm114_vm0, %v272_v39, 0.0  ;;  %v295_v49 = vsel %vm114_vm0, %v273_v42, 0.0  ;;  %v232_v37 = vrot.slane %v231_v29, 4  ;;  %v247_v38 = vsel %vm246_vm1, %v195_v31, %v188_v30  ;;  %v579_v1 = vld [vmem:[#allocation10] ss:$0 sm:$0xff] }
  0x63   :  { %v209_v39 = vadd.f32 %v208_v32, %v207_v24  ;;  %v344_v7 = vand.u32 127, %v343_v2  ;;  %v346_v8 = vshrl.u32 %v343_v2, 7  ;;  %vm385_vm11 = vcmask 64512  }
  0x64   :  { %278 = vadd.xlane.f32.xlu0 %v277_v35  ;;  %v215_v35 = vrot.slane %v214_v27, 1  ;;  %v233_v46 = vadd.f32 %v232_v37, %v231_v29 }
  0x65   :  { %284 = vadd.xlane.f32.xlu1 %v283_v36  ;;  %v227_v36 = vrot.slane %v226_v28, 2  ;;  %v347_v15 = vsub.s32 %v344_v7, %v346_v8 }
  0x66   :  { %v216_v42 = vadd.f32 %v215_v35, %v214_v27 }
  0x67   :  { %v228_v43 = vadd.f32 %v227_v36, %v226_v28 }
  0x68   :  { %287 = vadd.xlane.f32.xlu0 %v286_v40  ;;  %v222_v40 = vrot.slane %v221_v33, 1 }
  0x69   :  { %290 = vadd.xlane.f32.xlu1 %v289_v41  ;;  %v249_v41 = vsel %vm248_vm2, %v202_v34, %v247_v38  ;;  %v229_v48 = vrot.slane %v228_v43, 1 }
  0x6a   :  { %v251_v44 = vsel %vm250_vm3, %v209_v39, %v249_v41  ;;  %v223_v45 = vadd.f32 %v222_v40, %v221_v33 }
  0x6b   :  { %v230_v50 = vadd.f32 %v229_v48, %v228_v43 }
  0x6c   :  { %293 = vadd.xlane.f32.xlu0 %v292_v47  ;;  %v253_v47 = vsel %vm252_vm4, %v216_v42, %v251_v44 }
  0x6d   :  { %296 = vadd.xlane.f32.xlu1 %v295_v49  ;;  %v234_v49 = vrot.slane %v233_v46, 2  ;;  %v255_v51 = vsel %vm254_vm5, %v223_v45, %v253_v47 }
  0x6e   :  { %v257_v56 = vsel %vm256_vm6, %v230_v50, %v255_v51 }
  0x6f   :  { %v235_v52 = vadd.f32 %v234_v49, %v233_v46 }
  0x71   :  { %v236_v54 = vrot.slane %v235_v52, 1 }
  0x73   :  { %v237_v59 = vadd.f32 %v236_v54, %v235_v52 }
  0x75   :  { %v259_v61 = vsel %vm258_vm8, %v237_v59, %v257_v56  ;;  %v581_v59 = vld [vmem:[#allocation13] ss:$0 sm:$0xff] }
  0x76   :  { %v261_v63 = vadd.f32 %v259_v61, %v165_v58 }
  0x78   :  { %262 = vst.msk [vmem:[#allocation3] sm:$0xff] %vm114_vm0, %v261_v63 }
  0x7f   :  { %v314_v54 = vld [vmem:[#allocation3] sm:$0xff] }
  0x80   :  { %v315_v56 = vmul.f32 0.125, %v314_v54 }
  0x82   :  { %v316_v57 = vpack.c.bf16 %v315_v56, %v315_v56 }
  0xe9   :  { %v276_v3 = vpop.xlane.xlu0 %275 }
  0xea   :  { %v282_v4 = vpop.xlane.xlu1 %281  ;;  %v298_v5 = vmul.f32 0.0625, %v276_v3 }
  0xeb   :  { %v300_v6 = vmul.f32 0.0625, %v282_v4 }
  0xec   :  { %v306_v9 = vpack.c.bf16 %v298_v5, %v298_v5 }
  0xed   :  { %v308_v10 = vpack.c.bf16 %v300_v6, %v300_v6  ;;  %v279_v11 = vpop.xlane.xlu0 %278 }
  0xee   :  { %v285_v12 = vpop.xlane.xlu1 %284  ;;  %v299_v13 = vmul.f32 0.0625, %v279_v11  ;;  %v335_v16 = vunpack.c.l.b16 %v306_v9 }
  0xef   :  { %v301_v14 = vmul.f32 0.0625, %v285_v12  ;;  %v337_v19 = vunpack.c.l.b16 %v308_v10 }
  0xf0   :  { %v307_v17 = vpack.c.bf16 %v299_v13, %v299_v13  ;;  %v348_v26 = vrot.slane %v335_v16, %v347_v15 }
  0xf1   :  { %v309_v18 = vpack.c.bf16 %v301_v14, %v301_v14  ;;  %v288_v20 = vpop.xlane.xlu0 %287  ;;  %v356_v31 = vrot.slane %v337_v19, %v347_v15 }
  0xf2   :  { %v291_v21 = vpop.xlane.xlu1 %290  ;;  %v336_v22 = vunpack.c.l.b16 %v307_v17  ;;  %v302_v24 = vmul.f32 0.0625, %v288_v20 }
  0xf3   :  { %v338_v23 = vunpack.c.l.b16 %v309_v18  ;;  %v303_v25 = vmul.f32 0.0625, %v291_v21 }
  0xf4   :  { %v352_v27 = vrot.slane %v336_v22, %v347_v15  ;;  %v310_v29 = vpack.c.bf16 %v302_v24, %v302_v24 }
  0xf5   :  { %v360_v28 = vrot.slane %v338_v23, %v347_v15  ;;  %v311_v30 = vpack.c.bf16 %v303_v25, %v303_v25  ;;  %v294_v32 = vpop.xlane.xlu0 %293 }
  0xf6   :  { %v297_v33 = vpop.xlane.xlu1 %296  ;;  %v377_v34 = vsel %vm246_vm1, %v352_v27, %v348_v26  ;;  %v339_v35 = vunpack.c.l.b16 %v310_v29  ;;  %v304_v37 = vmul.f32 0.0625, %v294_v32 }
  0xf7   :  { %v340_v36 = vunpack.c.l.b16 %v311_v30  ;;  %v378_v38 = vsel %vm248_vm2, %v356_v31, %v377_v34  ;;  %v305_v39 = vmul.f32 0.0625, %v297_v33 }
  0xf8   :  { %v379_v40 = vsel %vm250_vm3, %v360_v28, %v378_v38  ;;  %v364_v41 = vrot.slane %v339_v35, %v347_v15  ;;  %v312_v42 = vpack.c.bf16 %v304_v37, %v304_v37 }
  0xf9   :  { %v368_v43 = vrot.slane %v340_v36, %v347_v15  ;;  %v313_v44 = vpack.c.bf16 %v305_v39, %v305_v39 }
  0xfa   :  { %v380_v45 = vsel %vm252_vm4, %v364_v41, %v379_v40  ;;  %v341_v46 = vunpack.c.l.b16 %v312_v42 }
  0xfb   :  { %v342_v47 = vunpack.c.l.b16 %v313_v44  ;;  %v381_v49 = vsel %vm254_vm5, %v368_v43, %v380_v45 }
  0xfc   :  { %v372_v48 = vrot.slane %v341_v46, %v347_v15 }
  0xfd   :  { %v376_v50 = vrot.slane %v342_v47, %v347_v15 }
  0xfe   :  { %v382_v51 = vsel %vm256_vm6, %v372_v48, %v381_v49 }
  0xff   :  { %v383_v52 = vsel %vm258_vm8, %v376_v50, %v382_v51 }
 0x100   :  { %v384_v55 = vpack.c.b16 %v383_v52, %v383_v52 }
 0x102   :  { %636 = vmatmul.mubr.msk.bf16.vlgmr.msra.gmra.mxu0 %vm385_vm11, %v384_v55 }
 0x103   :  { %648 = vmatpush3.bf16.msra.mxu0 %v666_v53  ;;  %649 = vmatprep.mubr.msk.bf16.mxu0 %vm826_vm9, %v825_v0  ;;  %v585_v0 = vld [vmem:[%s984_s8] ss:$0 sm:$0xff] }
 0x10a   :  { %650 = vmatmul.mubr.msk.bf16.vlgmr.msra.gmra.mxu0 %vm114_vm0, %v316_v57 }
 0x121   :  { %v494_v58 = vpop.f32.mrf.mxu1 }
 0x122   :  { %v495_v60 = vadd.f32 %v581_v59, %v494_v58 }
 0x123   :  { %v645_v61 = vpop.f32.mrf.mxu1 }
 0x124   :  { %559 = vst [vmem:[#allocation15 + $0x8] sm:$0xff] %v495_v60 }
 0x125   :  { %v497_v62 = vpop.f32.mrf.mxu1 }
 0x127   :  { %v646_v63 = vpop.f32.mrf.mxu1 }
 0x1c2   :  { %v427_v2 = vpop.f32.mrf.mxu0 }
 0x1c3   :  { %v428_v3 = vadd.f32 %v579_v1, %v427_v2 }
 0x1c4   :  { %v637_v4 = vpop.f32.mrf.mxu0 }
 0x1c5   :  { %558 = vst [vmem:[#allocation15] sm:$0xff] %v428_v3 }
 0x1c6   :  { %v430_v5 = vpop.f32.mrf.mxu0 }
 0x1c8   :  { %v638_v6 = vpop.f32.mrf.mxu0 }
 0x1ca   :  { %v552_v7 = vpop.f32.mrf.mxu0 }
 0x1cb   :  { %v553_v8 = vadd.f32 %v585_v0, %v552_v7 }
 0x1cc   :  { %v651_v9 = vpop.f32.mrf.mxu0 }
 0x1cd   :  { %560 = vst [vmem:[#allocation15 + $0x10] sm:$0xff] %v553_v8 }
 0x1ce   :  { %v555_v10 = vpop.f32.mrf.mxu0 }
 0x1cf   :  { %798 = shalt.err (!%p795_p6)
}
 0x1d0   :  { %570 = dma.vmem_to_hbm [thread:$0]  %s568_s21, 384, %s985_s9, [#allocation6]   ;;  %v652_v11 = vpop.f32.mrf.mxu0 }
 0x1d1   :  { %815 = dma.done.wait [#allocation6], 384  }
 0x1d2   :  { %816 = vsyncadd [#allocation6], 4294966912 }
 0x1d3   :  { %574 = vsyncpa [#allocation5], 1 }
 0x1d4   :  { %575 = vsyncpa [#allocation8], 1 }
 0x1d5   :  { %576 = vsyncpa [#allocation11], 1 }
 0x1d6   :  { %577 = vsyncpa [#allocation14], 1 }
 0x1d7   :  { %578 = vsyncpa [#allocation6], 1 }

</bundles_post_ra>
